<compile_context>
chip_gen: v6e
topology: v6e:2x2x1
jax: 0.10.0
libtpu: 0.0.40
codegen_flags: <defaults>
</compile_context>

<pallas_src>
import jax
import jax.numpy as jnp
from jax.experimental import pallas as pl
from jax.experimental.pallas import tpu as pltpu

EPS = 1e-5


# --------------------------------------------------------------------------------------
# Pass 1: per-channel, per-batch sum / sum-of-squares of the two 1x1 conv outputs (pre-BN).
# Refs: g (Fg, T), x (Fl, T), weights/biases small; stats outputs (Fint, 1) resident per n.
# --------------------------------------------------------------------------------------
def _stats_kernel(g_ref, x_ref, wg_ref, bg_ref, wx_ref, bx_ref,
                  sg_ref, qg_ref, sx_ref, qx_ref):
    @pl.when(pl.program_id(1) == 0)
    def _():
        sg_ref[...] = jnp.zeros_like(sg_ref)
        qg_ref[...] = jnp.zeros_like(qg_ref)
        sx_ref[...] = jnp.zeros_like(sx_ref)
        qx_ref[...] = jnp.zeros_like(qx_ref)

    # (F_int, C) @ (C, T) -> (F_int, T); pixels live on the lane axis.
    g1 = jnp.dot(wg_ref[...], g_ref[...], preferred_element_type=jnp.float32) + bg_ref[...]
    x1 = jnp.dot(wx_ref[...], x_ref[...], preferred_element_type=jnp.float32) + bx_ref[...]

    sg_ref[...] += jnp.sum(g1, axis=1, keepdims=True)
    qg_ref[...] += jnp.sum(g1 * g1, axis=1, keepdims=True)
    sx_ref[...] += jnp.sum(x1, axis=1, keepdims=True)
    qx_ref[...] += jnp.sum(x1 * x1, axis=1, keepdims=True)


# --------------------------------------------------------------------------------------
# Pass 2: psi pre-activation (BN folded into the conv weights) + its per-batch sum / sumsq.
# --------------------------------------------------------------------------------------
def _psi_kernel(g_ref, x_ref, wg_ref, bg_ref, wx_ref, bx_ref, wp_ref, bp_ref,
                p_ref, sp_ref, qp_ref):
    @pl.when(pl.program_id(1) == 0)
    def _():
        sp_ref[...] = jnp.zeros_like(sp_ref)
        qp_ref[...] = jnp.zeros_like(qp_ref)

    g1 = jnp.dot(wg_ref[...], g_ref[...], preferred_element_type=jnp.float32) + bg_ref[...]
    x1 = jnp.dot(wx_ref[...], x_ref[...], preferred_element_type=jnp.float32) + bx_ref[...]
    s = jnp.maximum(g1 + x1, 0.0)                                   # relu(g1 + x1)

    # 1x1 conv to a single channel: sublane reduction instead of a 1-row matmul.
    p = jnp.sum(s * wp_ref[...], axis=0, keepdims=True) + bp_ref[...]   # (1, T)
    p_ref[...] = p
    sp_ref[...] += jnp.sum(p, axis=1, keepdims=True)
    qp_ref[...] += jnp.sum(p * p, axis=1, keepdims=True)


# --------------------------------------------------------------------------------------
# Pass 3: out = x * sigmoid(BN(psi_pre))   (BN as a precomputed affine).
# --------------------------------------------------------------------------------------
def _gate_kernel(x_ref, p_ref, sc_ref, sh_ref, o_ref):
    z = p_ref[...] * sc_ref[...] + sh_ref[...]                  # (1, T)
    att = pl.reciprocal(1.0 + jnp.exp(-z), approx=False)        # sigmoid (exp on EUP)
    o_ref[...] = (x_ref[...] * att).astype(o_ref.dtype)         # broadcast over channels


# --------------------------------------------------------------------------------------
# Wrapper helpers
# --------------------------------------------------------------------------------------
def _vmem_limit_bytes():
    """Per-generation VMEM budget (conservative fallback if the query is unavailable)."""
    try:
        phys = pltpu.get_tpu_info().vmem_capacity_bytes
    except Exception:
        return 32 * 1024 * 1024
    if phys is None:
        return 32 * 1024 * 1024
    if phys <= 64 * 1024 * 1024:          # v7x-class: 64 MiB per TensorCore
        return 48 * 1024 * 1024
    return 80 * 1024 * 1024               # v5e / v6e: 128 MiB physical


def _choose_tile_hw(hw, fg, fl, budget_bytes):
    """Largest multiple-of-128 divisor of HW whose double-buffered working set fits."""
    if hw % 128 != 0:
        return hw                          # single full-row block (ragged lanes masked)
    # Worst-case bytes per lane per grid step (f32, x2 for double buffering):
    per_lane = max(fg + fl + 1, 2 * fl + 1) * 4 * 2
    t_budget = max(128, (budget_bytes // per_lane) // 128 * 128)
    t = min(hw, t_budget)
    t -= t % 128
    while t > 128 and hw % t != 0:
        t -= 128
    if t <= 0 or hw % t != 0:
        t = hw
    return t


def attention_block_forward(g, x, params, tile_hw=None):
    """g: (N, F_g, H, W), x: (N, F_l, H, W)  ->  (N, F_l, H, W), PyTorch NCHW convention."""
    (wg, bg, gam_g, bet_g,
     wx, bx, gam_x, bet_x,
     wp, bp, gam_p, bet_p) = params

    N, Fg, H, W = g.shape
    Fl = x.shape[1]
    Fint = wg.shape[0]
    HW = H * W
    M = N * HW
    f32 = jnp.float32

    vmem_limit = _vmem_limit_bytes()
    if tile_hw is None or HW % tile_hw != 0 or (tile_hw != HW and tile_hw % 128 != 0):
        tile_hw = _choose_tile_hw(HW, Fg, Fl, vmem_limit // 2)
    grid = (N, HW // tile_hw)

    # Free reshapes only — no relayout traffic.
    g3 = g.reshape(N, Fg, HW).astype(f32)
    x3 = x.reshape(N, Fl, HW).astype(f32)

    wg_m = wg.reshape(Fint, Fg).astype(f32)
    wx_m = wx.reshape(Fint, Fl).astype(f32)
    wp_c = wp.reshape(Fint, 1).astype(f32)
    bg_c = bg.reshape(Fint, 1).astype(f32)
    bx_c = bx.reshape(Fint, 1).astype(f32)
    bp_c = bp.reshape(1, 1).astype(f32)

    cp_reduce = pltpu.CompilerParams(dimension_semantics=("parallel", "arbitrary"),
                                     vmem_limit_bytes=vmem_limit)
    cp_gate = pltpu.CompilerParams(dimension_semantics=("parallel", "parallel"),
                                   vmem_limit_bytes=vmem_limit)

    def big(c):       # (channels, pixel-tile) slab of batch element n
        return pl.BlockSpec((pl.Squeezed(), c, tile_hw), lambda n, i: (n, 0, i))

    def small(r, c):  # small resident operand (weights / biases / affines)
        return pl.BlockSpec((r, c), lambda n, i: (0, 0))

    def per_batch(r):  # per-batch resident accumulator / row output
        return pl.BlockSpec((pl.Squeezed(), r, 1), lambda n, i: (n, 0, 0))

    # ---- Pass 1: BN statistics of the two conv branches (per-batch partials) -----------
    stat_shape = jax.ShapeDtypeStruct((N, Fint, 1), f32)
    sg, qg, sx, qx = pl.pallas_call(
        _stats_kernel,
        grid=grid,
        in_specs=[big(Fg), big(Fl), small(Fint, Fg), small(Fint, 1),
                  small(Fint, Fl), small(Fint, 1)],
        out_specs=[per_batch(Fint)] * 4,
        out_shape=[stat_shape] * 4,
        compiler_params=cp_reduce,
    )(g3, x3, wg_m, bg_c, wx_m, bx_c)

    # Finalize BN (few floats) and fold the affine into the conv weights/biases.
    def _affine(s_nc, q_nc, gamma, beta):
        s_tot = jnp.sum(s_nc, axis=0)[:, 0]            # (Fint,)
        q_tot = jnp.sum(q_nc, axis=0)[:, 0]
        mean = s_tot / M
        var = q_tot / M - mean * mean
        scale = gamma.astype(f32) * jax.lax.rsqrt(var + EPS)
        shift = beta.astype(f32) - mean * scale
        return scale, shift

    sc_g, sh_g = _affine(sg, qg, gam_g, bet_g)
    sc_x, sh_x = _affine(sx, qx, gam_x, bet_x)
    wg_eff = wg_m * sc_g[:, None]
    bg_eff = (bg.astype(f32) * sc_g + sh_g).reshape(Fint, 1)
    wx_eff = wx_m * sc_x[:, None]
    bx_eff = (bx.astype(f32) * sc_x + sh_x).reshape(Fint, 1)

    # ---- Pass 2: psi pre-activation + its BN statistics --------------------------------
    p_pre, sp, qp = pl.pallas_call(
        _psi_kernel,
        grid=grid,
        in_specs=[big(Fg), big(Fl), small(Fint, Fg), small(Fint, 1),
                  small(Fint, Fl), small(Fint, 1), small(Fint, 1), small(1, 1)],
        out_specs=[big(1), per_batch(1), per_batch(1)],
        out_shape=[jax.ShapeDtypeStruct((N, 1, HW), f32),
                   jax.ShapeDtypeStruct((N, 1, 1), f32),
                   jax.ShapeDtypeStruct((N, 1, 1), f32)],
        compiler_params=cp_reduce,
    )(g3, x3, wg_eff, bg_eff, wx_eff, bx_eff, wp_c, bp_c)

    mean_p = jnp.sum(sp) / M
    var_p = jnp.sum(qp) / M - mean_p * mean_p
    sc_p_s = gam_p.astype(f32).reshape(()) * jax.lax.rsqrt(var_p + EPS)
    sh_p_s = bet_p.astype(f32).reshape(()) - mean_p * sc_p_s
    sc_p = sc_p_s.reshape(1, 1)
    sh_p = sh_p_s.reshape(1, 1)

    # ---- Pass 3: out = x * sigmoid(BN(psi_pre)) -----------------------------------------
    out3 = pl.pallas_call(
        _gate_kernel,
        grid=grid,
        in_specs=[big(Fl), big(1), small(1, 1), small(1, 1)],
        out_specs=big(Fl),
        out_shape=jax.ShapeDtypeStruct((N, Fl, HW), x.dtype),
        compiler_params=cp_gate,
    )(x3, p_pre, sc_p, sh_p)

    return out3.reshape(N, Fl, H, W)      # free reshape back to NCHW


# --------------------------------------------------------------------------------------
# Pure-JAX reference matching PyTorch training-mode semantics (for the correctness check).
# --------------------------------------------------------------------------------------
def reference_forward(g, x, params):
    (wg, bg, gam_g, bet_g, wx, bx, gam_x, bet_x, wp, bp, gam_p, bet_p) = params

    def conv_bn(inp, w, b, gamma, beta):
        y = jax.lax.conv_general_dilated(
            inp, w, window_strides=(1, 1), padding="VALID",
            dimension_numbers=("NCHW", "OIHW", "NCHW")) + b.reshape(1, -1, 1, 1)
        mean = jnp.mean(y, axis=(0, 2, 3), keepdims=True)
        var = jnp.mean((y - mean) ** 2, axis=(0, 2, 3), keepdims=True)
        y = (y - mean) * jax.lax.rsqrt(var + EPS)
        return y * gamma.reshape(1, -1, 1, 1) + beta.reshape(1, -1, 1, 1)

    g1 = conv_bn(g, wg, bg, gam_g, bet_g)
    x1 = conv_bn(x, wx, bx, gam_x, bet_x)
    s = jnp.maximum(g1 + x1, 0.0)
    p = conv_bn(s, wp, bp, gam_p, bet_p)
    p = 1.0 / (1.0 + jnp.exp(-p))
    return x * p


if __name__ == "__main__":
    # Small deterministic setup: batch=2, F_g=F_l=4, F_int=8, spatial 16x16  (HW = 256).
    N, F_g, F_l, F_int, Hh, Ww = 2, 4, 4, 8, 16, 16
    key = jax.random.PRNGKey(0)
    ks = jax.random.split(key, 12)

    g = jax.random.normal(ks[0], (N, F_g, Hh, Ww), dtype=jnp.float32)
    x = jax.random.normal(ks[1], (N, F_l, Hh, Ww), dtype=jnp.float32)

    wg = 0.2 * jax.random.normal(ks[2], (F_int, F_g, 1, 1), dtype=jnp.float32)
    bg = 0.05 * jax.random.normal(ks[3], (F_int,), dtype=jnp.float32)
    gam_g = 1.0 + 0.1 * jax.random.normal(ks[4], (F_int,), dtype=jnp.float32)
    bet_g = 0.05 * jax.random.normal(ks[5], (F_int,), dtype=jnp.float32)

    wx = 0.2 * jax.random.normal(ks[6], (F_int, F_l, 1, 1), dtype=jnp.float32)
    bx = 0.05 * jax.random.normal(ks[7], (F_int,), dtype=jnp.float32)
    gam_x = 1.0 + 0.1 * jax.random.normal(ks[8], (F_int,), dtype=jnp.float32)
    bet_x = 0.05 * jax.random.normal(ks[9], (F_int,), dtype=jnp.float32)

    wp = 0.2 * jax.random.normal(ks[10], (1, F_int, 1, 1), dtype=jnp.float32)
    bp = 0.05 * jax.random.normal(ks[11], (1,), dtype=jnp.float32)
    gam_p = jnp.ones((1,), dtype=jnp.float32)     # BN default init
    bet_p = jnp.zeros((1,), dtype=jnp.float32)

    params = (wg, bg, gam_g, bet_g, wx, bx, gam_x, bet_x, wp, bp, gam_p, bet_p)

    ref = jax.block_until_ready(reference_forward(g, x, params))

    # Auto (VMEM-budgeted) tile: single pixel-tile per batch element here.
    out_auto = jax.block_until_ready(attention_block_forward(g, x, params))
    # Forced small tile: exercises the cross-tile stats accumulation path (grid (N, 2)).
    out_small = jax.block_until_ready(attention_block_forward(g, x, params, tile_hw=128))

    for out in (out_auto, out_small):
        assert out.shape == (N, F_l, Hh, Ww), out.shape
        max_err = float(jnp.max(jnp.abs(out - ref)))
        assert jnp.allclose(out, ref, atol=1e-4, rtol=1e-4), max_err

    print("KERNEL_OK")
</pallas_src>

<mosaic_0001>
module attributes {stable_mosaic.version = 11 : i64} {
  func.func @_stats_kernel(%arg0: i32, %arg1: i32, %arg2: memref<1x4x256xf32, #tpu.memory_space<vmem>>, %arg3: memref<1x4x256xf32, #tpu.memory_space<vmem>>, %arg4: memref<8x4xf32, #tpu.memory_space<vmem>>, %arg5: memref<8x1xf32, #tpu.memory_space<vmem>>, %arg6: memref<8x4xf32, #tpu.memory_space<vmem>>, %arg7: memref<8x1xf32, #tpu.memory_space<vmem>>, %arg8: memref<1x8x1xf32, #tpu.memory_space<vmem>>, %arg9: memref<1x8x1xf32, #tpu.memory_space<vmem>>, %arg10: memref<1x8x1xf32, #tpu.memory_space<vmem>>, %arg11: memref<1x8x1xf32, #tpu.memory_space<vmem>>) attributes {dimension_semantics = [#tpu.dimension_semantics<parallel>, #tpu.dimension_semantics<arbitrary>], iteration_bounds = array<i64: 2, 1>, scalar_prefetch = 0 : i64, scratch_operands = 0 : i64, tpu.core_type = #tpu.core_type<tc>, window_params = [{transform_indices = @transform_0, window_bounds = array<i64: 1, 4, 256>}, {transform_indices = @transform_1, window_bounds = array<i64: 1, 4, 256>}, {pipeline_mode = #tpu.pipeline_mode<synchronous>, transform_indices = @transform_2, window_bounds = array<i64: 8, 4>}, {pipeline_mode = #tpu.pipeline_mode<synchronous>, transform_indices = @transform_3, window_bounds = array<i64: 8, 1>}, {pipeline_mode = #tpu.pipeline_mode<synchronous>, transform_indices = @transform_4, window_bounds = array<i64: 8, 4>}, {pipeline_mode = #tpu.pipeline_mode<synchronous>, transform_indices = @transform_5, window_bounds = array<i64: 8, 1>}, {transform_indices = @transform_6, window_bounds = array<i64: 1, 8, 1>}, {transform_indices = @transform_7, window_bounds = array<i64: 1, 8, 1>}, {transform_indices = @transform_8, window_bounds = array<i64: 1, 8, 1>}, {transform_indices = @transform_9, window_bounds = array<i64: 1, 8, 1>}]} {
    %c0_i32 = arith.constant 0 : i32
    %0 = arith.cmpi eq, %arg1, %c0_i32 : i32
    %1 = arith.extui %0 : i1 to i32
    %c0_i32_0 = arith.constant 0 : i32
    %2 = arith.cmpi ne, %1, %c0_i32_0 : i32
    scf.if %2 {
      %cst_43 = arith.constant 0.000000e+00 : f32
      %51 = vector.broadcast %cst_43 : f32 to vector<8x1xf32>
      %c0_44 = arith.constant 0 : index
      %c0_45 = arith.constant 0 : index
      %c0_46 = arith.constant 0 : index
      %52 = vector.load %arg8[%c0_44, %c0_45, %c0_46] : memref<1x8x1xf32, #tpu.memory_space<vmem>>, vector<1x8x1xf32>
      %53 = vector.shape_cast %52 : vector<1x8x1xf32> to vector<8x1xf32>
      %54 = vector.shape_cast %51 : vector<8x1xf32> to vector<1x8x1xf32>
      tpu.vector_store %arg8[%c0_44, %c0_45, %c0_46], %54 {strides = array<i32>} : memref<1x8x1xf32, #tpu.memory_space<vmem>>, vector<1x8x1xf32>,
      %cst_47 = arith.constant 0.000000e+00 : f32
      %55 = vector.broadcast %cst_47 : f32 to vector<8x1xf32>
      %c0_48 = arith.constant 0 : index
      %c0_49 = arith.constant 0 : index
      %c0_50 = arith.constant 0 : index
      %56 = vector.load %arg9[%c0_48, %c0_49, %c0_50] : memref<1x8x1xf32, #tpu.memory_space<vmem>>, vector<1x8x1xf32>
      %57 = vector.shape_cast %56 : vector<1x8x1xf32> to vector<8x1xf32>
      %58 = vector.shape_cast %55 : vector<8x1xf32> to vector<1x8x1xf32>
      tpu.vector_store %arg9[%c0_48, %c0_49, %c0_50], %58 {strides = array<i32>} : memref<1x8x1xf32, #tpu.memory_space<vmem>>, vector<1x8x1xf32>,
      %cst_51 = arith.constant 0.000000e+00 : f32
      %59 = vector.broadcast %cst_51 : f32 to vector<8x1xf32>
      %c0_52 = arith.constant 0 : index
      %c0_53 = arith.constant 0 : index
      %c0_54 = arith.constant 0 : index
      %60 = vector.load %arg10[%c0_52, %c0_53, %c0_54] : memref<1x8x1xf32, #tpu.memory_space<vmem>>, vector<1x8x1xf32>
      %61 = vector.shape_cast %60 : vector<1x8x1xf32> to vector<8x1xf32>
      %62 = vector.shape_cast %59 : vector<8x1xf32> to vector<1x8x1xf32>
      tpu.vector_store %arg10[%c0_52, %c0_53, %c0_54], %62 {strides = array<i32>} : memref<1x8x1xf32, #tpu.memory_space<vmem>>, vector<1x8x1xf32>,
      %cst_55 = arith.constant 0.000000e+00 : f32
      %63 = vector.broadcast %cst_55 : f32 to vector<8x1xf32>
      %c0_56 = arith.constant 0 : index
      %c0_57 = arith.constant 0 : index
      %c0_58 = arith.constant 0 : index
      %64 = vector.load %arg11[%c0_56, %c0_57, %c0_58] : memref<1x8x1xf32, #tpu.memory_space<vmem>>, vector<1x8x1xf32>
      %65 = vector.shape_cast %64 : vector<1x8x1xf32> to vector<8x1xf32>
      %66 = vector.shape_cast %63 : vector<8x1xf32> to vector<1x8x1xf32>
      tpu.vector_store %arg11[%c0_56, %c0_57, %c0_58], %66 {strides = array<i32>} : memref<1x8x1xf32, #tpu.memory_space<vmem>>, vector<1x8x1xf32>,
    } else {
    }
    %c0 = arith.constant 0 : index
    %c0_1 = arith.constant 0 : index
    %3 = vector.load %arg4[%c0, %c0_1] : memref<8x4xf32, #tpu.memory_space<vmem>>, vector<8x4xf32>
    %c0_2 = arith.constant 0 : index
    %c0_3 = arith.constant 0 : index
    %c0_4 = arith.constant 0 : index
    %4 = vector.load %arg2[%c0_2, %c0_3, %c0_4] : memref<1x4x256xf32, #tpu.memory_space<vmem>>, vector<1x4x256xf32>
    %5 = vector.shape_cast %4 : vector<1x4x256xf32> to vector<4x256xf32>
    %cst = arith.constant dense<0.000000e+00> : vector<8x256xf32>
    %6 = tpu.matmul %3, %5, %cst {dimension_numbers = #tpu.dot_dimension_numbers<[1], [0], [0], [1], [0, 0, 1, 1], [], []>} : vector<8x4xf32>, vector<4x256xf32>, vector<8x256xf32> -> vector<8x256xf32>
    %c0_5 = arith.constant 0 : index
    %c0_6 = arith.constant 0 : index
    %7 = vector.load %arg5[%c0_5, %c0_6] : memref<8x1xf32, #tpu.memory_space<vmem>>, vector<8x1xf32>
    %8 = vector.broadcast %7 : vector<8x1xf32> to vector<8x256xf32>
    %9 = arith.addf %6, %8 : vector<8x256xf32>
    %c0_7 = arith.constant 0 : index
    %c0_8 = arith.constant 0 : index
    %10 = vector.load %arg6[%c0_7, %c0_8] : memref<8x4xf32, #tpu.memory_space<vmem>>, vector<8x4xf32>
    %c0_9 = arith.constant 0 : index
    %c0_10 = arith.constant 0 : index
    %c0_11 = arith.constant 0 : index
    %11 = vector.load %arg3[%c0_9, %c0_10, %c0_11] : memref<1x4x256xf32, #tpu.memory_space<vmem>>, vector<1x4x256xf32>
    %12 = vector.shape_cast %11 : vector<1x4x256xf32> to vector<4x256xf32>
    %cst_12 = arith.constant dense<0.000000e+00> : vector<8x256xf32>
    %13 = tpu.matmul %10, %12, %cst_12 {dimension_numbers = #tpu.dot_dimension_numbers<[1], [0], [0], [1], [0, 0, 1, 1], [], []>} : vector<8x4xf32>, vector<4x256xf32>, vector<8x256xf32> -> vector<8x256xf32>
    %c0_13 = arith.constant 0 : index
    %c0_14 = arith.constant 0 : index
    %14 = vector.load %arg7[%c0_13, %c0_14] : memref<8x1xf32, #tpu.memory_space<vmem>>, vector<8x1xf32>
    %15 = vector.broadcast %14 : vector<8x1xf32> to vector<8x256xf32>
    %16 = arith.addf %13, %15 : vector<8x256xf32>
    %c0_15 = arith.constant 0 : index
    %c0_16 = arith.constant 0 : index
    %c0_17 = arith.constant 0 : index
    %17 = vector.load %arg8[%c0_15, %c0_16, %c0_17] : memref<1x8x1xf32, #tpu.memory_space<vmem>>, vector<1x8x1xf32>
    %18 = vector.shape_cast %17 : vector<1x8x1xf32> to vector<8x1xf32>
    %cst_18 = arith.constant dense<0.000000e+00> : vector<8xf32>
    %19 = vector.multi_reduction <add>, %9, %cst_18 [1] : vector<8x256xf32> to vector<8xf32>
    %20 = vector.shape_cast %19 : vector<8xf32> to vector<8x1xf32>
    %21 = arith.addf %18, %20 : vector<8x1xf32>
    %c0_19 = arith.constant 0 : index
    %c0_20 = arith.constant 0 : index
    %c0_21 = arith.constant 0 : index
    %22 = vector.load %arg8[%c0_19, %c0_20, %c0_21] : memref<1x8x1xf32, #tpu.memory_space<vmem>>, vector<1x8x1xf32>
    %23 = vector.shape_cast %22 : vector<1x8x1xf32> to vector<8x1xf32>
    %24 = vector.shape_cast %21 : vector<8x1xf32> to vector<1x8x1xf32>
    tpu.vector_store %arg8[%c0_19, %c0_20, %c0_21], %24 {strides = array<i32>} : memref<1x8x1xf32, #tpu.memory_space<vmem>>, vector<1x8x1xf32>,
    %c0_22 = arith.constant 0 : index
    %c0_23 = arith.constant 0 : index
    %c0_24 = arith.constant 0 : index
    %25 = vector.load %arg9[%c0_22, %c0_23, %c0_24] : memref<1x8x1xf32, #tpu.memory_space<vmem>>, vector<1x8x1xf32>
    %26 = vector.shape_cast %25 : vector<1x8x1xf32> to vector<8x1xf32>
    %27 = arith.mulf %9, %9 : vector<8x256xf32>
    %cst_25 = arith.constant dense<0.000000e+00> : vector<8xf32>
    %28 = vector.multi_reduction <add>, %27, %cst_25 [1] : vector<8x256xf32> to vector<8xf32>
    %29 = vector.shape_cast %28 : vector<8xf32> to vector<8x1xf32>
    %30 = arith.addf %26, %29 : vector<8x1xf32>
    %c0_26 = arith.constant 0 : index
    %c0_27 = arith.constant 0 : index
    %c0_28 = arith.constant 0 : index
    %31 = vector.load %arg9[%c0_26, %c0_27, %c0_28] : memref<1x8x1xf32, #tpu.memory_space<vmem>>, vector<1x8x1xf32>
    %32 = vector.shape_cast %31 : vector<1x8x1xf32> to vector<8x1xf32>
    %33 = vector.shape_cast %30 : vector<8x1xf32> to vector<1x8x1xf32>
    tpu.vector_store %arg9[%c0_26, %c0_27, %c0_28], %33 {strides = array<i32>} : memref<1x8x1xf32, #tpu.memory_space<vmem>>, vector<1x8x1xf32>,
    %c0_29 = arith.constant 0 : index
    %c0_30 = arith.constant 0 : index
    %c0_31 = arith.constant 0 : index
    %34 = vector.load %arg10[%c0_29, %c0_30, %c0_31] : memref<1x8x1xf32, #tpu.memory_space<vmem>>, vector<1x8x1xf32>
    %35 = vector.shape_cast %34 : vector<1x8x1xf32> to vector<8x1xf32>
    %cst_32 = arith.constant dense<0.000000e+00> : vector<8xf32>
    %36 = vector.multi_reduction <add>, %16, %cst_32 [1] : vector<8x256xf32> to vector<8xf32>
    %37 = vector.shape_cast %36 : vector<8xf32> to vector<8x1xf32>
    %38 = arith.addf %35, %37 : vector<8x1xf32>
    %c0_33 = arith.constant 0 : index
    %c0_34 = arith.constant 0 : index
    %c0_35 = arith.constant 0 : index
    %39 = vector.load %arg10[%c0_33, %c0_34, %c0_35] : memref<1x8x1xf32, #tpu.memory_space<vmem>>, vector<1x8x1xf32>
    %40 = vector.shape_cast %39 : vector<1x8x1xf32> to vector<8x1xf32>
    %41 = vector.shape_cast %38 : vector<8x1xf32> to vector<1x8x1xf32>
    tpu.vector_store %arg10[%c0_33, %c0_34, %c0_35], %41 {strides = array<i32>} : memref<1x8x1xf32, #tpu.memory_space<vmem>>, vector<1x8x1xf32>,
    %c0_36 = arith.constant 0 : index
    %c0_37 = arith.constant 0 : index
    %c0_38 = arith.constant 0 : index
    %42 = vector.load %arg11[%c0_36, %c0_37, %c0_38] : memref<1x8x1xf32, #tpu.memory_space<vmem>>, vector<1x8x1xf32>
    %43 = vector.shape_cast %42 : vector<1x8x1xf32> to vector<8x1xf32>
    %44 = arith.mulf %16, %16 : vector<8x256xf32>
    %cst_39 = arith.constant dense<0.000000e+00> : vector<8xf32>
    %45 = vector.multi_reduction <add>, %44, %cst_39 [1] : vector<8x256xf32> to vector<8xf32>
    %46 = vector.shape_cast %45 : vector<8xf32> to vector<8x1xf32>
    %47 = arith.addf %43, %46 : vector<8x1xf32>
    %c0_40 = arith.constant 0 : index
    %c0_41 = arith.constant 0 : index
    %c0_42 = arith.constant 0 : index
    %48 = vector.load %arg11[%c0_40, %c0_41, %c0_42] : memref<1x8x1xf32, #tpu.memory_space<vmem>>, vector<1x8x1xf32>
    %49 = vector.shape_cast %48 : vector<1x8x1xf32> to vector<8x1xf32>
    %50 = vector.shape_cast %47 : vector<8x1xf32> to vector<1x8x1xf32>
    tpu.vector_store %arg11[%c0_40, %c0_41, %c0_42], %50 {strides = array<i32>} : memref<1x8x1xf32, #tpu.memory_space<vmem>>, vector<1x8x1xf32>,
    return
  }
  func.func @transform_0(%arg0: i32, %arg1: i32) -> (i32, i32, i32) {
    %c0_i32 = arith.constant 0 : i32
    %c0_i32_0 = arith.constant 0 : i32
    return %arg0, %c0_i32, %arg1 : i32, i32, i32
  }
  func.func @transform_1(%arg0: i32, %arg1: i32) -> (i32, i32, i32) {
    %c0_i32 = arith.constant 0 : i32
    %c0_i32_0 = arith.constant 0 : i32
    return %arg0, %c0_i32, %arg1 : i32, i32, i32
  }
  func.func @transform_2(%arg0: i32, %arg1: i32) -> (i32, i32) {
    %c0_i32 = arith.constant 0 : i32
    %c0_i32_0 = arith.constant 0 : i32
    %c0_i32_1 = arith.constant 0 : i32
    return %c0_i32, %c0_i32_0 : i32, i32
  }
  func.func @transform_3(%arg0: i32, %arg1: i32) -> (i32, i32) {
    %c0_i32 = arith.constant 0 : i32
    %c0_i32_0 = arith.constant 0 : i32
    %c0_i32_1 = arith.constant 0 : i32
    return %c0_i32, %c0_i32_0 : i32, i32
  }
  func.func @transform_4(%arg0: i32, %arg1: i32) -> (i32, i32) {
    %c0_i32 = arith.constant 0 : i32
    %c0_i32_0 = arith.constant 0 : i32
    %c0_i32_1 = arith.constant 0 : i32
    return %c0_i32, %c0_i32_0 : i32, i32
  }
  func.func @transform_5(%arg0: i32, %arg1: i32) -> (i32, i32) {
    %c0_i32 = arith.constant 0 : i32
    %c0_i32_0 = arith.constant 0 : i32
    %c0_i32_1 = arith.constant 0 : i32
    return %c0_i32, %c0_i32_0 : i32, i32
  }
  func.func @transform_6(%arg0: i32, %arg1: i32) -> (i32, i32, i32) {
    %c0_i32 = arith.constant 0 : i32
    %c0_i32_0 = arith.constant 0 : i32
    %c0_i32_1 = arith.constant 0 : i32
    return %arg0, %c0_i32, %c0_i32_0 : i32, i32, i32
  }
  func.func @transform_7(%arg0: i32, %arg1: i32) -> (i32, i32, i32) {
    %c0_i32 = arith.constant 0 : i32
    %c0_i32_0 = arith.constant 0 : i32
    %c0_i32_1 = arith.constant 0 : i32
    return %arg0, %c0_i32, %c0_i32_0 : i32, i32, i32
  }
  func.func @transform_8(%arg0: i32, %arg1: i32) -> (i32, i32, i32) {
    %c0_i32 = arith.constant 0 : i32
    %c0_i32_0 = arith.constant 0 : i32
    %c0_i32_1 = arith.constant 0 : i32
    return %arg0, %c0_i32, %c0_i32_0 : i32, i32, i32
  }
  func.func @transform_9(%arg0: i32, %arg1: i32) -> (i32, i32, i32) {
    %c0_i32 = arith.constant 0 : i32
    %c0_i32_0 = arith.constant 0 : i32
    %c0_i32_1 = arith.constant 0 : i32
    return %arg0, %c0_i32, %c0_i32_0 : i32, i32, i32
  }
}

</mosaic_0001>

<bundles_post_ra>
// kernel: tpu_custom_call.1
= control target key start
LH: loop header
LB: loop body
LE: loop exit
PB: predicated region body
PF: predicated region fallthrough
CT: control target
= control target key end

     0   :  { %s948_s30 = smov 0   ;;  %s950_s10 = smov 0   ;;  %s1026_s0 = inlined_call_operand.vmem [shape: f32[2,4,256], index: 0, kind: input, shape index: {}]   ;;  %s1027_s1 = inlined_call_operand.vmem [shape: f32[2,4,256], index: 1, kind: input, shape index: {}]   ;;  %s1028_s2 = inlined_call_operand.vmem [shape: f32[8,4], index: 2, kind: input, shape index: {}]   ;;  %s1029_s3 = inlined_call_operand.vmem [shape: f32[8,1], index: 3, kind: input, shape index: {}]   ;;  %s1030_s4 = inlined_call_operand.vmem [shape: f32[8,4], index: 4, kind: input, shape index: {}]   ;;  %s1031_s5 = inlined_call_operand.vmem [shape: f32[8,1], index: 5, kind: input, shape index: {}]   ;;  %s1032_s6 = inlined_call_operand.vmem [shape: f32[2,8,1], index: 6, kind: output, shape index: {0}]   ;;  %s1033_s7 = inlined_call_operand.vmem [shape: f32[2,8,1], index: 7, kind: output, shape index: {1}]   ;;  %s1034_s8 = inlined_call_operand.vmem [shape: f32[2,8,1], index: 8, kind: output, shape index: {2}]   ;;  %s1035_s9 = inlined_call_operand.vmem [shape: f32[2,8,1], index: 9, kind: output, shape index: {3}]  }
   0x1   :  { %s952_s11 = smov 0  }
   0x2 LB: > { %s32_s12 = sadd.s32 1, %s890_s10  ;;  %p824_p0 = scmp.ge.s32.totalorder %s894_s11, 1  ;;  %s894_s11 = sphi %s952_s11, %s20_s11   ;;  %s890_s10 = sphi %s950_s10, %s1037_s10   ;;  %s886_s30 = sphi %s948_s30, %s1036_s30  }
   0x3   : > { %p34_p1 = scmp.ge.s32.totalorder %s32_s12, 2  ;;  %p330_p2 = scmp.lt.s32.totalorder %s894_s11, 3 }
   0x5   : > { %s1039_s12 = smov (%p34_p1, %s32_s12), 0  ;;  %p331_p3 = pnand %p824_p0, %p330_p2 }
   0x6   : > { %p391_p4 = scmp.lt.s32.totalorder (!%p331_p3), %s886_s30, 1 }
   0x7   : > { %334 = sbr.rel (%p331_p3) target bundleno = 369 (0x171), region = 44 }
   0xc   : > { %v896_v0 = vmov 0.0   ;;  %v437_v1 = vld [vmem:[%s1029_s3] sm:$0xff]  ;;  %s1041_s30 = smov (!%p391_p4, %s886_s30), 1  ;;  %v897_v2 = vmov 0   ;;  %vm449_vm0 = vcmask 1043456   ;;  %vm445_vm1 = vcmask 31744  }
   0xd   : > { %518 = vmatprep.mubr.f32.mxu0 %v896_v0  ;;  %606 = vmatprep.mubr.f32.mxu1 %v896_v0  ;;  %s969_s15 = sshll.u32 %s1041_s30, 3  ;;  %v527_v3 = vld [vmem:[%s1031_s5] sm:$0xff]  ;;  %vm430_vm2 = vcmask 7168  }
   0xe   : > { %869 = vset.pattern.permute.xlu0 %v897_v2  ;;  %s398_s20 = scalar_lea.vmem %s1026_s0, %s969_s15  ;;  %s408_s23 = scalar_lea.vmem %s1027_s1, %s969_s15  ;;  %v435_v8 = vld [vmem:[%s1028_s2] sm:$0xff] }
   0xf   : > { %440 = vperm.xlu0 %869, %v437_v1   ;;  %v436_v4 = vld [vmem:[%s398_s20] sm:$0xff]  ;;  %s992_s30 = scalar_lea.vmem %s1034_s8, %s969_s15  ;;  %s413_s16 = scalar_lea.vmem %s1032_s6, %s969_s15 }
  0x10   : > { %v526_v5 = vld [vmem:[%s408_s23] sm:$0xff]  ;;  %v444_v6 = vcombine.high %v436_v4, %v436_v4  ;;  %433 = vst.msk [vmem:[%s992_s30] sm:$0xff] %vm430_vm2, %v896_v0  ;;  %431 = vst.msk [vmem:[%s413_s16] sm:$0xff] %vm430_vm2, %v896_v0  ;;  %s417_s19 = scalar_lea.vmem %s1033_s7, %s969_s15  ;;  %s425_s22 = scalar_lea.vmem %s1035_s9, %s969_s15 }
  0x11   : > { %v534_v7 = vcombine.high %v526_v5, %v526_v5  ;;  %v525_v9 = vld [vmem:[%s1030_s4] sm:$0xff]  ;;  %432 = vst.msk [vmem:[%s417_s19] sm:$0xff] %vm430_vm2, %v896_v0  ;;  %434 = vst.msk [vmem:[%s425_s22] sm:$0xff] %vm430_vm2, %v896_v0 }
  0x12   : > { %833 = vmatprep.subr.msk.mxu0 %vm449_vm0, %v444_v6 }
  0x13   : > { %530 = vperm.xlu0 %869, %v527_v3   ;;  %836 = vmatprep.subr.msk.mxu1 %vm449_vm0, %v534_v7 }
  0x14   : > { %834 = vmatpush1.msk.msra.mxu0 %vm449_vm0, %v436_v4  ;;  %837 = vmatpush1.msk.msra.mxu1 %vm449_vm0, %v526_v5 }
  0x15   : > { %835 = vmatmul.mubr.msk.f32.vlgmr.msra.gmra.mxu0 %vm445_vm1, %v435_v8  ;;  %838 = vmatmul.mubr.msk.f32.vlgmr.msra.gmra.mxu1 %vm445_vm1, %v525_v9 }
  0x17   : > { %v628_v28 = vld [vmem:[%s992_s30] sm:$0xff] }
  0x18   : > { %v613_v29 = vld [vmem:[%s413_s16] sm:$0xff] }
  0x19   : > { %v620_v34 = vld [vmem:[%s417_s19] sm:$0xff] }
  0x1a   : > { %v634_v37 = vld [vmem:[%s425_s22] sm:$0xff] }
  0x8a   : > { %v441_v10 = vpop.permute.xlu0 %440 }
  0x8e   : > { %v531_v11 = vpop.permute.xlu0 %530 }
  0xd5   : > { %v520_v12 = vpop.f32.mrf.mxu0  ;;  %v608_v13 = vpop.f32.mrf.mxu1 }
  0xd6   : > { %v609_v14 = vadd.f32 %v608_v13, %v531_v11  ;;  %v521_v17 = vadd.f32 %v520_v12, %v441_v10 }
  0xd7   : > { %v522_v15 = vpop.f32.mrf.mxu0  ;;  %v610_v16 = vpop.f32.mrf.mxu1 }
  0xd8   : > { %v523_v18 = vadd.f32 %v522_v15, %v441_v10  ;;  %v611_v19 = vadd.f32 %v610_v16, %v531_v11  ;;  %v621_v23 = vmul.f32 %v521_v17, %v521_v17  ;;  %v635_v26 = vmul.f32 %v609_v14, %v609_v14 }
  0xda   : > { %v622_v20 = vmul.f32 %v523_v18, %v523_v18  ;;  %v629_v21 = vadd.f32 %v611_v19, %v609_v14  ;;  %v614_v22 = vadd.f32 %v523_v18, %v521_v17  ;;  %v636_v24 = vmul.f32 %v611_v19, %v611_v19 }
  0xdc   : > { %630 = vadd.xlane.f32.xlu0 %v629_v21  ;;  %615 = vadd.xlane.f32.xlu1 %v614_v22  ;;  %v623_v25 = vadd.f32 %v622_v20, %v621_v23  ;;  %v637_v27 = vadd.f32 %v636_v24, %v635_v26 }
  0xe0   : > { %624 = vadd.xlane.f32.xlu1 %v623_v25 }
  0xe4   : > { %638 = vadd.xlane.f32.xlu1 %v637_v27 }
 0x165   : > { %v631_v30 = vpop.xlane.xlu0 %630  ;;  %v616_v31 = vpop.xlane.xlu1 %615 }
 0x166   : > { %v632_v32 = vadd.f32 %v631_v30, %v628_v28  ;;  %v617_v33 = vadd.f32 %v616_v31, %v613_v29 }
 0x168   : > { %633 = vst.msk [vmem:[%s992_s30] sm:$0xff] %vm430_vm2, %v632_v32  ;;  %619 = vst.msk [vmem:[%s413_s16] sm:$0xff] %vm430_vm2, %v617_v33 }
 0x169   : > { %v625_v35 = vpop.xlane.xlu1 %624 }
 0x16a   : > { %v626_v36 = vadd.f32 %v625_v35, %v620_v34 }
 0x16c   : > { %627 = vst.msk [vmem:[%s417_s19] sm:$0xff] %vm430_vm2, %v626_v36 }
 0x16d   : > { %v639_v38 = vpop.xlane.xlu1 %638 }
 0x16e   : > { %v640_v39 = vadd.f32 %v639_v38, %v634_v37 }
 0x170   : > { %641 = vst.msk [vmem:[%s425_s22] sm:$0xff] %vm430_vm2, %v640_v39 }
 0x171 PF: > { %s20_s11 = sadd.s32 1, %s894_s11   ;;  %s1036_s30 = smov %s890_s10 }
 0x172   : > { %p17_p5 = scmp.ge.s32.totalorder %s20_s11, 4   ;;  %s1037_s10 = smov %s1039_s12 }
 0x174   :  { %19 = sbr.rel (!%p17_p5) target bundleno = 2 (0x2), region = 117 }

</bundles_post_ra>
